<compile_context>
chip_gen: v7x
topology: tpu7x:2x2x1
jax: 0.10.0
libtpu: 0.0.40
codegen_flags: <defaults>
</compile_context>

<pallas_src>
import jax
import jax.numpy as jnp
from jax.experimental import pallas as pl
from jax.experimental.pallas import tpu as pltpu


def make_gin_kernel(one_plus_eps):
    """Fused (1+eps)*x + agg -> Linear -> ReLU -> Linear -> +x residual (packed rows)."""

    def kernel(x_ref, agg_ref, w1_ref, b1_ref, w2_ref, b2_ref, o_ref):
        x = x_ref[...]                                   # [TM, Fp]  (P nodes per row)
        if one_plus_eps == 1.0:                          # fold eps=0 at trace time
            z = x + agg_ref[...]
        else:
            z = one_plus_eps * x + agg_ref[...]
        # gin_net MLP on the MXU; block-diagonal weights keep packed nodes independent.
        h1 = jnp.dot(z, w1_ref[...], preferred_element_type=jnp.float32) + b1_ref[...]
        h1 = jnp.maximum(h1, 0.0)
        h = jnp.dot(h1, w2_ref[...], preferred_element_type=jnp.float32) + b2_ref[...]
        # batchnorm = Identity (batch_norm=False); dropout = identity (eval mode)
        o_ref[...] = h + x                               # residual

    return kernel


def gin_layer_forward(x, edge_index, params, eps=0.0):
    """x: [N, F] float32, edge_index: [2, E] int32 (row 0 = src, row 1 = dst)."""
    N, F = x.shape
    H = params["w1"].shape[1]
    LANE = 128

    # --- wrapper glue: sparse sum-aggregation (no dense adjacency) --------------
    src = edge_index[0]
    dst = edge_index[1]
    agg = jnp.zeros((N, F), x.dtype).at[dst].add(x[src])   # segment-sum over edges

    # --- free lane packing: P nodes per 128-lane row when 128 % F == 0 ----------
    P = LANE // F if LANE % F == 0 else 1
    F_pack = P * F
    H_pack = P * H
    Fp = pl.cdiv(F_pack, LANE) * LANE      # == 128 in the packed case
    Hp = pl.cdiv(H_pack, LANE) * LANE

    def block_diag_pad(w, rows_p, cols_p):
        blk = jnp.kron(jnp.eye(P, dtype=w.dtype), w)        # [P*in, P*out] block diag
        return jnp.pad(blk, ((0, rows_p - blk.shape[0]), (0, cols_p - blk.shape[1])))

    w1p = block_diag_pad(params["w1"], Fp, Hp)
    w2p = block_diag_pad(params["w2"], Hp, Fp)
    b1p = jnp.pad(jnp.tile(params["b1"], P), (0, Hp - H_pack)).reshape(1, Hp)
    b2p = jnp.pad(jnp.tile(params["b2"], P), (0, Fp - F_pack)).reshape(1, Fp)

    # --- row tile sizing over packed rows ----------------------------------------
    # Big enough to amortize the ~0.35us/step overhead, small enough that large
    # graphs keep >= MIN_STEPS grid steps (megacore split + small last-tile waste).
    N_pack = pl.cdiv(N, P)
    TM_MAX = 512                            # 512 packed rows == 2048 nodes at P=4
    MIN_STEPS = 4
    TM = max(8, min(TM_MAX, pl.cdiv(pl.cdiv(N_pack, MIN_STEPS), 8) * 8))
    Np_pack = pl.cdiv(N_pack, TM) * TM
    N_rows = Np_pack * P                    # node rows after padding

    def pack(a):
        a = jnp.pad(a, ((0, N_rows - N), (0, 0)))
        a = a.reshape(Np_pack, F_pack)      # pure row-major repack, no data movement
        if Fp > F_pack:                     # fallback path (128 % F != 0)
            a = jnp.pad(a, ((0, 0), (0, Fp - F_pack)))
        return a

    xp = pack(x)
    aggp = pack(agg)

    # --- pallas call --------------------------------------------------------------
    row_spec = pl.BlockSpec((TM, Fp), lambda i: (i, 0))             # streamed per tile
    resident = lambda shape: pl.BlockSpec(shape, lambda i: (0, 0))  # stays in VMEM

    cost = pl.CostEstimate(
        flops=2 * Np_pack * Fp * Hp + 2 * Np_pack * Hp * Fp + 4 * Np_pack * Fp,
        transcendentals=0,
        bytes_accessed=4 * (3 * Np_pack * Fp + 2 * Fp * Hp + Hp + Fp),
    )

    out = pl.pallas_call(
        make_gin_kernel(1.0 + float(eps)),
        out_shape=jax.ShapeDtypeStruct((Np_pack, Fp), jnp.float32),
        grid=(Np_pack // TM,),
        in_specs=[
            row_spec,                 # packed x tile     [TM, Fp]
            row_spec,                 # packed agg tile   [TM, Fp]
            resident((Fp, Hp)),       # block-diag W1 (resident)
            resident((1, Hp)),        # tiled b1      (resident)
            resident((Hp, Fp)),       # block-diag W2 (resident)
            resident((1, Fp)),        # tiled b2      (resident)
        ],
        out_specs=row_spec,
        compiler_params=pltpu.CompilerParams(
            dimension_semantics=("parallel",),     # megacore split on v7x
            vmem_limit_bytes=32 * 1024 * 1024,     # safe on v5e/v6e/v7x
        ),
        cost_estimate=cost,
    )(xp, aggp, w1p, b1p, w2p, b2p)

    # unpack: drop padded lanes, restore node rows, drop padded nodes
    return out[:, :F_pack].reshape(N_rows, F)[:N]


def reference_forward(x, edge_index, params, eps=0.0):
    N = x.shape[0]
    src, dst = edge_index[0], edge_index[1]
    A = jnp.zeros((N, N), jnp.float32).at[dst, src].add(1.0)
    z = (1.0 + eps) * x + A @ x
    h1 = jnp.maximum(z @ params["w1"] + params["b1"], 0.0)
    h = h1 @ params["w2"] + params["b2"]
    return h + x


if __name__ == "__main__":
    # Small, module-consistent shapes: in_features = out_features = 32 (residual
    # requires equality), mlp_hidden_dim = in_features = 32, N = 16 nodes, E = 40 edges.
    N, F, H, E = 16, 32, 32, 40

    key = jax.random.PRNGKey(0)
    kx, ke1, ke2, kw1, kb1, kw2, kb2 = jax.random.split(key, 7)

    x = jax.random.normal(kx, (N, F), jnp.float32)
    edge_index = jnp.stack(
        [
            jax.random.randint(ke1, (E,), 0, N, jnp.int32),
            jax.random.randint(ke2, (E,), 0, N, jnp.int32),
        ],
        axis=0,
    )

    # Deterministic parameter init (PyTorch Linear-style uniform bounds).
    bound1 = 1.0 / (F ** 0.5)
    bound2 = 1.0 / (H ** 0.5)
    params = {
        "w1": jax.random.uniform(kw1, (F, H), jnp.float32, -bound1, bound1),
        "b1": jax.random.uniform(kb1, (H,), jnp.float32, -bound1, bound1),
        "w2": jax.random.uniform(kw2, (H, F), jnp.float32, -bound2, bound2),
        "b2": jax.random.uniform(kb2, (F,), jnp.float32, -bound2, bound2),
    }

    out = gin_layer_forward(x, edge_index, params)
    out = jax.block_until_ready(out)

    ref = reference_forward(x, edge_index, params)
    assert out.shape == (N, F)
    assert jnp.allclose(out, ref, atol=1e-4, rtol=1e-4), "mismatch vs reference"

    print("KERNEL_OK")
</pallas_src>

<mosaic_0001>
module attributes {stable_mosaic.version = 11 : i64} {
  func.func @kernel(%arg0: i32, %arg1: memref<8x128xf32, #tpu.memory_space<vmem>>, %arg2: memref<8x128xf32, #tpu.memory_space<vmem>>, %arg3: memref<128x128xf32, #tpu.memory_space<vmem>>, %arg4: memref<1x128xf32, #tpu.memory_space<vmem>>, %arg5: memref<128x128xf32, #tpu.memory_space<vmem>>, %arg6: memref<1x128xf32, #tpu.memory_space<vmem>>, %arg7: memref<8x128xf32, #tpu.memory_space<vmem>>) attributes {dimension_semantics = [#tpu.dimension_semantics<parallel>], iteration_bounds = array<i64: 1>, scalar_prefetch = 0 : i64, scratch_operands = 0 : i64, tpu.core_type = #tpu.core_type<tc>, window_params = [{transform_indices = @transform_0, window_bounds = array<i64: 8, 128>}, {transform_indices = @transform_1, window_bounds = array<i64: 8, 128>}, {pipeline_mode = #tpu.pipeline_mode<synchronous>, transform_indices = @transform_2, window_bounds = array<i64: 128, 128>}, {pipeline_mode = #tpu.pipeline_mode<synchronous>, transform_indices = @transform_3, window_bounds = array<i64: 1, 128>}, {pipeline_mode = #tpu.pipeline_mode<synchronous>, transform_indices = @transform_4, window_bounds = array<i64: 128, 128>}, {pipeline_mode = #tpu.pipeline_mode<synchronous>, transform_indices = @transform_5, window_bounds = array<i64: 1, 128>}, {transform_indices = @transform_6, window_bounds = array<i64: 8, 128>}]} {
    %c0 = arith.constant 0 : index
    %c0_0 = arith.constant 0 : index
    %0 = vector.load %arg1[%c0, %c0_0] : memref<8x128xf32, #tpu.memory_space<vmem>>, vector<8x128xf32>
    %c0_1 = arith.constant 0 : index
    %c0_2 = arith.constant 0 : index
    %1 = vector.load %arg2[%c0_1, %c0_2] : memref<8x128xf32, #tpu.memory_space<vmem>>, vector<8x128xf32>
    %2 = arith.addf %0, %1 : vector<8x128xf32>
    %c0_3 = arith.constant 0 : index
    %c0_4 = arith.constant 0 : index
    %3 = vector.load %arg3[%c0_3, %c0_4] : memref<128x128xf32, #tpu.memory_space<vmem>>, vector<128x128xf32>
    %cst = arith.constant dense<0.000000e+00> : vector<8x128xf32>
    %4 = tpu.matmul %2, %3, %cst {dimension_numbers = #tpu.dot_dimension_numbers<[1], [0], [0], [1], [0, 0, 1, 1], [], []>} : vector<8x128xf32>, vector<128x128xf32>, vector<8x128xf32> -> vector<8x128xf32>
    %c0_5 = arith.constant 0 : index
    %c0_6 = arith.constant 0 : index
    %5 = vector.load %arg4[%c0_5, %c0_6] : memref<1x128xf32, #tpu.memory_space<vmem>>, vector<1x128xf32>
    %6 = vector.broadcast %5 : vector<1x128xf32> to vector<8x128xf32>
    %7 = arith.addf %4, %6 : vector<8x128xf32>
    %cst_7 = arith.constant 0.000000e+00 : f32
    %8 = vector.broadcast %cst_7 : f32 to vector<8x128xf32>
    %9 = arith.maximumf %7, %8 : vector<8x128xf32>
    %c0_8 = arith.constant 0 : index
    %c0_9 = arith.constant 0 : index
    %10 = vector.load %arg5[%c0_8, %c0_9] : memref<128x128xf32, #tpu.memory_space<vmem>>, vector<128x128xf32>
    %cst_10 = arith.constant dense<0.000000e+00> : vector<8x128xf32>
    %11 = tpu.matmul %9, %10, %cst_10 {dimension_numbers = #tpu.dot_dimension_numbers<[1], [0], [0], [1], [0, 0, 1, 1], [], []>} : vector<8x128xf32>, vector<128x128xf32>, vector<8x128xf32> -> vector<8x128xf32>
    %c0_11 = arith.constant 0 : index
    %c0_12 = arith.constant 0 : index
    %12 = vector.load %arg6[%c0_11, %c0_12] : memref<1x128xf32, #tpu.memory_space<vmem>>, vector<1x128xf32>
    %13 = vector.broadcast %12 : vector<1x128xf32> to vector<8x128xf32>
    %14 = arith.addf %11, %13 : vector<8x128xf32>
    %15 = arith.addf %14, %0 : vector<8x128xf32>
    %c0_13 = arith.constant 0 : index
    %c0_14 = arith.constant 0 : index
    %16 = vector.load %arg7[%c0_13, %c0_14] : memref<8x128xf32, #tpu.memory_space<vmem>>, vector<8x128xf32>
    tpu.vector_store %arg7[%c0_13, %c0_14], %15 {strides = array<i32>} : memref<8x128xf32, #tpu.memory_space<vmem>>, vector<8x128xf32>,
    return
  }
  func.func @transform_0(%arg0: i32) -> (i32, i32) {
    %c0_i32 = arith.constant 0 : i32
    %c0_i32_0 = arith.constant 0 : i32
    return %arg0, %c0_i32 : i32, i32
  }
  func.func @transform_1(%arg0: i32) -> (i32, i32) {
    %c0_i32 = arith.constant 0 : i32
    %c0_i32_0 = arith.constant 0 : i32
    return %arg0, %c0_i32 : i32, i32
  }
  func.func @transform_2(%arg0: i32) -> (i32, i32) {
    %c0_i32 = arith.constant 0 : i32
    %c0_i32_0 = arith.constant 0 : i32
    %c0_i32_1 = arith.constant 0 : i32
    return %c0_i32, %c0_i32_0 : i32, i32
  }
  func.func @transform_3(%arg0: i32) -> (i32, i32) {
    %c0_i32 = arith.constant 0 : i32
    %c0_i32_0 = arith.constant 0 : i32
    %c0_i32_1 = arith.constant 0 : i32
    return %c0_i32, %c0_i32_0 : i32, i32
  }
  func.func @transform_4(%arg0: i32) -> (i32, i32) {
    %c0_i32 = arith.constant 0 : i32
    %c0_i32_0 = arith.constant 0 : i32
    %c0_i32_1 = arith.constant 0 : i32
    return %c0_i32, %c0_i32_0 : i32, i32
  }
  func.func @transform_5(%arg0: i32) -> (i32, i32) {
    %c0_i32 = arith.constant 0 : i32
    %c0_i32_0 = arith.constant 0 : i32
    %c0_i32_1 = arith.constant 0 : i32
    return %c0_i32, %c0_i32_0 : i32, i32
  }
  func.func @transform_6(%arg0: i32) -> (i32, i32) {
    %c0_i32 = arith.constant 0 : i32
    %c0_i32_0 = arith.constant 0 : i32
    return %arg0, %c0_i32 : i32, i32
  }
}

</mosaic_0001>

<bundles_post_ra>
// kernel: tpu_custom_call.1
= control target key start
LH: loop header
LB: loop body
LE: loop exit
PB: predicated region body
PF: predicated region fallthrough
CT: control target
= control target key end

     0   :  { %11 = vsyncpa [#allocation3], 0  ;;  %s693_s0 = inlined_call_operand.hbm [shape: f32[8,128], index: 0, kind: input, shape index: {}]   ;;  %s694_s1 = inlined_call_operand.hbm [shape: f32[8,128], index: 1, kind: input, shape index: {}]   ;;  %s695_s2 = inlined_call_operand.hbm [shape: f32[128,128], index: 2, kind: input, shape index: {}]   ;;  %s696_s3 = inlined_call_operand.vmem [shape: f32[1,128], index: 3, kind: input, shape index: {}]   ;;  %s697_s4 = inlined_call_operand.hbm [shape: f32[128,128], index: 4, kind: input, shape index: {}]   ;;  %s698_s5 = inlined_call_operand.vmem [shape: f32[1,128], index: 5, kind: input, shape index: {}]   ;;  %s699_s6 = inlined_call_operand.hbm [shape: f32[8,128], index: 6, kind: output, shape index: {}]  }
   0x1   :  { %12 = vsyncpa [#allocation6], 0 }
   0x2   :  { %13 = vsyncpa [#allocation9], 0 }
   0x3   :  { %14 = vsyncpa [#allocation4], 0  ;;  %s566_s21 = smov [#allocation5]   ;;  %s567_s23 = smov [#allocation2]  }
   0x4   :  { %s31_s22 = sshll.u32 %s566_s21, 4  ;;  %s21_s24 = sshll.u32 %s567_s23, 4  ;;  %s32_s22 = int_to_ptr.vmem [resolvable:$true] %s31_s22  ;;  %s22_s24 = int_to_ptr.vmem [resolvable:$true] %s21_s24 }
   0x5   :  { %s448_s27 = scalar_lea.hbm %s694_s1, 128 }
   0x6   :  { %p449_p0 = scmp.ne.s32.totalorder %s694_s1, %s448_s27  ;;  %p452_p1 = scmp.lt.u32.totalorder %s448_s27, %s694_s1 }
   0x8   :  { %p454_p2 = pnand %p452_p1, %p449_p0 }
   0xa   :  { %457 = shalt.err (!%p454_p2)
}
   0xb   :  { %s458_s8 = scalar_lea.vmem %s32_s22, 128  ;;  %p463_p4 = scmp.lt.s32.totalorder %s32_s22, %s32_s22 }
   0xc   :  { %p459_p3 = scmp.ne.s32.totalorder %s32_s22, %s458_s8  ;;  %p464_p5 = scmp.lt.s32.totalorder %s458_s8, %s458_s8 }
   0xe   :  { %p465_p6 = por %p464_p5, %p463_p4 }
  0x10   :  { %p466_p7 = pnand %p465_p6, %p459_p3 }
  0x12   :  { %469 = shalt.err (!%p466_p7)
}
  0x13   :  { %34 = dma.hbm_to_vmem [thread:$0]  %s694_s1, 128, %s32_s22, [#allocation6]  }
  0x14   :  { %s470_s13 = scalar_lea.hbm %s693_s0, 128 }
  0x15   :  { %p471_p8 = scmp.ne.s32.totalorder %s693_s0, %s470_s13  ;;  %p474_p9 = scmp.lt.u32.totalorder %s470_s13, %s693_s0 }
  0x17   :  { %p476_p10 = pnand %p474_p9, %p471_p8 }
  0x19   :  { %479 = shalt.err (!%p476_p10)
}
  0x1a   :  { %s480_s18 = scalar_lea.vmem %s22_s24, 128  ;;  %p485_p12 = scmp.lt.s32.totalorder %s22_s24, %s22_s24 }
  0x1b   :  { %p481_p11 = scmp.ne.s32.totalorder %s22_s24, %s480_s18  ;;  %p486_p13 = scmp.lt.s32.totalorder %s480_s18, %s480_s18 }
  0x1d   :  { %p487_p0 = por %p486_p13, %p485_p12 }
  0x1f   :  { %p488_p1 = pnand %p487_p0, %p481_p11 }
  0x21   :  { %491 = shalt.err (!%p488_p1)
}
  0x22   :  { %24 = dma.hbm_to_vmem [thread:$0]  %s693_s0, 128, %s22_s24, [#allocation3]  }
  0x23   :  { %s568_s20 = smov [#allocation7]   ;;  %s492_s25 = scalar_lea.hbm %s695_s2, 2048 }
  0x24   :  { %s40_s21 = sshll.u32 %s568_s20, 4  ;;  %p493_p2 = scmp.ne.s32.totalorder %s695_s2, %s492_s25  ;;  %s41_s21 = int_to_ptr.vmem [resolvable:$true] %s40_s21 }
  0x25   :  { %p496_p3 = scmp.lt.u32.totalorder %s492_s25, %s695_s2 }
  0x27   :  { %p498_p4 = pnand %p496_p3, %p493_p2 }
  0x29   :  { %501 = shalt.err (!%p498_p4)
}
  0x2a   :  { %s502_s30 = scalar_lea.vmem %s41_s21, 2048  ;;  %p507_p6 = scmp.lt.s32.totalorder %s41_s21, %s41_s21 }
  0x2b   :  { %p503_p5 = scmp.ne.s32.totalorder %s41_s21, %s502_s30  ;;  %p508_p7 = scmp.lt.s32.totalorder %s502_s30, %s502_s30 }
  0x2d   :  { %p509_p8 = por %p508_p7, %p507_p6 }
  0x2f   :  { %p510_p9 = pnand %p509_p8, %p503_p5 }
  0x31   :  { %513 = shalt.err (!%p510_p9)
}
  0x32   :  { %s569_s0 = smov 128   ;;  %s570_s24 = smov 8  }
  0x33   :  { %46 = dma.hbm_to_vmem [thread:$0]  %s695_s2, 2048, %s41_s21, [#allocation6], %s569_s0, %s569_s0, %s570_s24  }
  0x34   :  { %s571_s9 = smov [#allocation8]   ;;  %s514_s13 = scalar_lea.hbm %s697_s4, 2048 }
  0x35   :  { %s54_s10 = sshll.u32 %s571_s9, 4  ;;  %p515_p10 = scmp.ne.s32.totalorder %s697_s4, %s514_s13  ;;  %s55_s10 = int_to_ptr.vmem [resolvable:$true] %s54_s10 }
  0x36   :  { %p518_p11 = scmp.lt.u32.totalorder %s514_s13, %s697_s4 }
  0x38   :  { %p520_p12 = pnand %p518_p11, %p515_p10 }
  0x3a   :  { %523 = shalt.err (!%p520_p12)
}
  0x3b   :  { %s524_s18 = scalar_lea.vmem %s55_s10, 2048  ;;  %p529_p0 = scmp.lt.s32.totalorder %s55_s10, %s55_s10 }
  0x3c   :  { %p525_p13 = scmp.ne.s32.totalorder %s55_s10, %s524_s18  ;;  %p530_p1 = scmp.lt.s32.totalorder %s524_s18, %s524_s18 }
  0x3e   :  { %p531_p2 = por %p530_p1, %p529_p0 }
  0x40   :  { %p532_p3 = pnand %p531_p2, %p525_p13 }
  0x42   :  { %535 = shalt.err (!%p532_p3)
}
  0x43   :  { %60 = dma.hbm_to_vmem [thread:$0]  %s697_s4, 2048, %s55_s10, [#allocation9], %s569_s0, %s569_s0, %s570_s24  }
  0x44   :  { %558 = dma.done.wait [#allocation3], 128  }
  0x45   :  { %559 = vsyncadd [#allocation3], 4294967168 }
  0x46   :  { %560 = dma.done.wait [#allocation6], 2176  }
  0x47   :  { %561 = vsyncadd [#allocation6], 4294965120 }
  0x48   :  { %562 = dma.done.wait [#allocation9], 2048  }
  0x49   :  { %563 = vsyncadd [#allocation9], 4294965248  ;;  %v572_v0 = vmov 0.0|0.0   ;;  %vm573_vm0 = vmmov 0   ;;  %v574_v1 = vmov 0.0   ;;  %v78_v2 = vld [vmem:[#allocation7] sm:$0xff] }
  0x4a   :  { %390 = vmatprep.subr.bf16.mxu0 %v572_v0  ;;  %352 = vmatprep.mubr.msk.f32.mxu0 %vm573_vm0, %v574_v1  ;;  %v79_v3 = vld [vmem:[#allocation7 + $0x8] sm:$0xff]  ;;  %v80_v4 = vld [vmem:[#allocation7 + $0x10] sm:$0xff]  ;;  %v81_v6 = vld [vmem:[#allocation7 + $0x18] sm:$0xff]  ;;  %s575_s22 = smov [#allocation10]  }
  0x4b   :  { %414 = vmatprep.subr.bf16.mxu1 %v572_v0  ;;  %387 = vmatprep.mubr.msk.f32.mxu1 %vm573_vm0, %v574_v1  ;;  %v391_v5 = vpack.c.bf16 %v79_v3, %v78_v2  ;;  %v394_v7 = vpack.c.bf16 %v81_v6, %v80_v4  ;;  %v82_v8 = vld [vmem:[#allocation7 + $0x20] sm:$0xff]  ;;  %v83_v9 = vld [vmem:[#allocation7 + $0x28] sm:$0xff]  ;;  %v174_v12 = vld [vmem:[#allocation8 + $0x10] sm:$0xff]  ;;  %s273_s23 = sshll.u32 %s575_s22, 4  ;;  %s274_s23 = int_to_ptr.vmem [resolvable:$true] %s273_s23 }
  0x4c   :  { %v172_v10 = vld [vmem:[#allocation8] sm:$0xff]  ;;  %v173_v11 = vld [vmem:[#allocation8 + $0x8] sm:$0xff]  ;;  %v397_v13 = vpack.c.bf16 %v83_v9, %v82_v8  ;;  %v175_v15 = vld [vmem:[#allocation8 + $0x18] sm:$0xff]  ;;  %s536_s25 = scalar_lea.vmem %s274_s23, 128  ;;  %p541_p5 = scmp.lt.s32.totalorder %s274_s23, %s274_s23 }
  0x4d   :  { %392 = vmatpush3.bf16.msra.mxu0 %v391_v5  ;;  %v415_v14 = vpack.c.bf16 %v173_v11, %v172_v10  ;;  %v84_v16 = vld [vmem:[#allocation7 + $0x30] sm:$0xff]  ;;  %v85_v17 = vld [vmem:[#allocation7 + $0x38] sm:$0xff]  ;;  %v418_v18 = vpack.c.bf16 %v175_v15, %v174_v12  ;;  %v176_v19 = vld [vmem:[#allocation8 + $0x20] sm:$0xff]  ;;  %p537_p4 = scmp.ne.s32.totalorder %s274_s23, %s536_s25  ;;  %p542_p6 = scmp.lt.s32.totalorder %s536_s25, %s536_s25 }
  0x4e   :  { %393 = vmatprep.subr.bf16.mxu0 %v572_v0  ;;  %v177_v20 = vld [vmem:[#allocation8 + $0x28] sm:$0xff]  ;;  %v400_v21 = vpack.c.bf16 %v85_v17, %v84_v16  ;;  %v86_v22 = vld [vmem:[#allocation7 + $0x40] sm:$0xff]  ;;  %v178_v25 = vld [vmem:[#allocation8 + $0x30] sm:$0xff] }
  0x4f   :  { %416 = vmatpush3.bf16.msra.mxu1 %v415_v14  ;;  %v87_v23 = vld [vmem:[#allocation7 + $0x48] sm:$0xff]  ;;  %v421_v24 = vpack.c.bf16 %v177_v20, %v176_v19  ;;  %v179_v26 = vld [vmem:[#allocation8 + $0x38] sm:$0xff]  ;;  %v88_v28 = vld [vmem:[#allocation7 + $0x50] sm:$0xff]  ;;  %p543_p7 = por %p542_p6, %p541_p5 }
  0x50   :  { %417 = vmatprep.subr.bf16.mxu1 %v572_v0  ;;  %v403_v27 = vpack.c.bf16 %v87_v23, %v86_v22  ;;  %v89_v29 = vld [vmem:[#allocation7 + $0x58] sm:$0xff]  ;;  %v424_v30 = vpack.c.bf16 %v179_v26, %v178_v25  ;;  %v180_v31 = vld [vmem:[#allocation8 + $0x40] sm:$0xff]  ;;  %v181_v32 = vld [vmem:[#allocation8 + $0x48] sm:$0xff] }
  0x51   :  { %395 = vmatpush3.bf16.msra.mxu0 %v394_v7  ;;  %v406_v33 = vpack.c.bf16 %v89_v29, %v88_v28  ;;  %v90_v34 = vld [vmem:[#allocation7 + $0x60] sm:$0xff]  ;;  %v91_v35 = vld [vmem:[#allocation7 + $0x68] sm:$0xff]  ;;  %v427_v36 = vpack.c.bf16 %v181_v32, %v180_v31  ;;  %v182_v37 = vld [vmem:[#allocation8 + $0x50] sm:$0xff]  ;;  %p544_p8 = pnand %p543_p7, %p537_p4 }
  0x52   :  { %396 = vmatprep.subr.bf16.mxu0 %v572_v0  ;;  %v183_v38 = vld [vmem:[#allocation8 + $0x58] sm:$0xff]  ;;  %v409_v39 = vpack.c.bf16 %v91_v35, %v90_v34  ;;  %v92_v40 = vld [vmem:[#allocation7 + $0x70] sm:$0xff]  ;;  %v184_v43 = vld [vmem:[#allocation8 + $0x60] sm:$0xff] }
  0x53   :  { %419 = vmatpush3.bf16.msra.mxu1 %v418_v18  ;;  %v93_v41 = vld [vmem:[#allocation7 + $0x78] sm:$0xff]  ;;  %v430_v42 = vpack.c.bf16 %v183_v38, %v182_v37  ;;  %v185_v44 = vld [vmem:[#allocation8 + $0x68] sm:$0xff]  ;;  %v75_v46 = vld [vmem:[#allocation2] sm:$0xff] }
  0x54   :  { %420 = vmatprep.subr.bf16.mxu1 %v572_v0  ;;  %v412_v45 = vpack.c.bf16 %v93_v41, %v92_v40  ;;  %v76_v47 = vld [vmem:[#allocation5] sm:$0xff]  ;;  %v433_v48 = vpack.c.bf16 %v185_v44, %v184_v43  ;;  %v186_v50 = vld [vmem:[#allocation8 + $0x70] sm:$0xff] }
  0x55   :  { %398 = vmatpush3.bf16.msra.mxu0 %v397_v13  ;;  %v77_v49 = vadd.f32 %v76_v47, %v75_v46  ;;  %v187_v51 = vld [vmem:[#allocation8 + $0x78] sm:$0xff]  ;;  %v284_v53 = vld [vmem:[%s696_s3] ss:$0 sm:$0xff] }
  0x56   :  { %399 = vmatprep.subr.bf16.mxu0 %v572_v0  ;;  %v436_v52 = vpack.c.bf16 %v187_v51, %v186_v50  ;;  %v285_v58 = vld [vmem:[%s698_s5] ss:$0 sm:$0xff] }
  0x57   :  { %422 = vmatpush3.bf16.msra.mxu1 %v421_v24 }
  0x58   :  { %423 = vmatprep.subr.bf16.mxu1 %v572_v0 }
  0x59   :  { %401 = vmatpush3.bf16.msra.mxu0 %v400_v21 }
  0x5a   :  { %402 = vmatprep.subr.bf16.mxu0 %v572_v0 }
  0x5b   :  { %425 = vmatpush3.bf16.msra.mxu1 %v424_v30 }
  0x5c   :  { %426 = vmatprep.subr.bf16.mxu1 %v572_v0 }
  0x5d   :  { %404 = vmatpush3.bf16.msra.mxu0 %v403_v27 }
  0x5e   :  { %405 = vmatprep.subr.bf16.mxu0 %v572_v0 }
  0x5f   :  { %428 = vmatpush3.bf16.msra.mxu1 %v427_v36 }
  0x60   :  { %429 = vmatprep.subr.bf16.mxu1 %v572_v0 }
  0x61   :  { %407 = vmatpush3.bf16.msra.mxu0 %v406_v33 }
  0x62   :  { %408 = vmatprep.subr.bf16.mxu0 %v572_v0 }
  0x63   :  { %431 = vmatpush3.bf16.msra.mxu1 %v430_v42 }
  0x64   :  { %432 = vmatprep.subr.bf16.mxu1 %v572_v0 }
  0x65   :  { %410 = vmatpush3.bf16.msra.mxu0 %v409_v39 }
  0x66   :  { %411 = vmatprep.subr.bf16.mxu0 %v572_v0 }
  0x67   :  { %434 = vmatpush3.bf16.msra.mxu1 %v433_v48 }
  0x68   :  { %435 = vmatprep.subr.bf16.mxu1 %v572_v0 }
  0x69   :  { %413 = vmatpush3.bf16.msra.mxu0 %v412_v45 }
  0x6b   :  { %437 = vmatpush3.bf16.msra.mxu1 %v436_v52 }
  0x6c   :  { %353 = vmatmul.mubr.f32.vlgmr.msra.gmra.mrb[0].mxu0 %v77_v49 }
 0x13f   :  { %v167_v54 = vpop.f32.mrb[0].mxu0 }
 0x140   :  { %v168_v55 = vadd.f32 %v284_v53, %v167_v54  ;;  %v354_v56 = vpop.f32.mrb[1].mxu0 }
 0x142   :  { %v171_v57 = vmax.f32 %v168_v55, 0.0 }
 0x144   :  { %388 = vmatmul.mubr.f32.vlgmr.msra.gmra.mrb[0].mxu1 %v171_v57 }
 0x217   :  { %v261_v59 = vpop.f32.mrb[0].mxu1 }
 0x218   :  { %v262_v60 = vadd.f32 %v285_v58, %v261_v59  ;;  %v389_v61 = vpop.f32.mrb[1].mxu1 }
 0x21a   :  { %v265_v62 = vadd.f32 %v262_v60, %v75_v46 }
 0x21c   :  { %266 = vst [vmem:[#allocation10] sm:$0xff] %v265_v62 }
 0x21d   :  { %547 = shalt.err (!%p544_p8)
}
 0x21e   :  { %s548_s27 = scalar_lea.hbm %s699_s6, 128 }
 0x21f   :  { %p549_p9 = scmp.ne.s32.totalorder %s699_s6, %s548_s27  ;;  %p552_p10 = scmp.lt.u32.totalorder %s548_s27, %s699_s6 }
 0x221   :  { %p554_p11 = pnand %p552_p10, %p549_p9 }
 0x223   :  { %557 = shalt.err (!%p554_p11)
}
 0x224   :  { %276 = dma.vmem_to_hbm [thread:$0]  %s274_s23, 128, %s699_s6, [#allocation4]  }
 0x225   :  { %564 = dma.done.wait [#allocation4], 128  }
 0x226   :  { %565 = vsyncadd [#allocation4], 4294967168 }
 0x227   :  { %280 = vsyncpa [#allocation3], 1 }
 0x228   :  { %281 = vsyncpa [#allocation6], 1 }
 0x229   :  { %282 = vsyncpa [#allocation9], 1 }
 0x22a   :  { %283 = vsyncpa [#allocation4], 1 }

</bundles_post_ra>
